<compile_context>
chip_gen: v7x
topology: tpu7x:2x2x1
jax: 0.10.0
libtpu: 0.0.40
codegen_flags: <defaults>
</compile_context>

<pallas_src>
import jax
import jax.numpy as jnp
from jax import lax
from jax.experimental import pallas as pl
from jax.experimental.pallas import tpu as pltpu


def _cdiv(a, b):
    return -(-a // b)


def _auto_compute_dtype():
    """bf16 compute on bf16-native generations (v6e/v7x); f32 otherwise."""
    try:
        kind = jax.devices()[0].device_kind.lower()
    except Exception:
        return jnp.float32
    if ("v6" in kind) or ("v7" in kind):
        return jnp.bfloat16
    return jnp.float32


def _make_mlp_kernel(num_linear, positive, sigmoid, compute_dtype):
    """Kernel for `num_linear` Linear layers (tanh after all but the last).

    Ref order: (z_ref, w0, b0, ..., w_{L-1}, b_{L-1}, o_ref) where hidden
    weights are (out, in), hidden biases (out, 1), the final weight is
    (width, 1) and the final bias (1, 1).  Output block is (1, tb).
    """
    num_hidden = num_linear - 1
    assert num_hidden >= 1

    def kernel(*refs):
        z_ref = refs[0]
        o_ref = refs[-1]
        p = refs[1:-1]

        # (tb, n_trees) block; batch moves onto lanes via the first MXU
        # contraction (trans_b) below -- no explicit transpose, no wrapper
        # HBM round-trip on Z.
        z = z_ref[...].astype(compute_dtype)                 # (tb, n_trees)

        # First hidden layer: (out, in) x (tb, in)^T  ->  (out, tb)
        w0 = p[0][...]                                       # (out, in)
        b0 = p[1][...]                                       # (out, 1) f32
        pre = lax.dot_general(
            w0, z, (((1,), (1,)), ((), ())),
            preferred_element_type=jnp.float32) + b0         # (out, tb) f32
        h = jnp.tanh(pre.astype(compute_dtype))              # (out, tb)

        # Remaining hidden layers (unrolled; each weight read once).
        for l in range(1, num_hidden):
            w = p[2 * l][...]                                # (out, in)
            b = p[2 * l + 1][...]                            # (out, 1) f32
            pre = jnp.dot(w, h, preferred_element_type=jnp.float32) + b
            h = jnp.tanh(pre.astype(compute_dtype))          # (out, tb)

        # Final Linear(width, 1): VPU multiply (lane-broadcast of (width, 1))
        # + sublane reduce on the XLU -> lane-dense (1, tb) row.
        w_last = p[2 * num_hidden][...]                      # (width, 1) f32
        b_last = p[2 * num_hidden + 1][...]                  # (1, 1) f32
        out = jnp.sum(h.astype(jnp.float32) * w_last,
                      axis=0, keepdims=True) + b_last        # (1, tb) f32

        if positive:
            # Numerically stable softplus (matches torch.nn.Softplus,
            # beta=1, threshold=20): passthrough above the threshold.
            sp = jnp.log1p(jnp.exp(jnp.minimum(out, 20.0)))
            out = jnp.where(out > 20.0, out, sp)
        elif sigmoid:
            out = jax.nn.sigmoid(out)

        o_ref[...] = out.astype(o_ref.dtype)

    return kernel


def _choose_batch_tile(B, batch_tile):
    """Batch tile: multiple of 128 (lane-dense output writes), big enough to
    amortize the ~0.35us per-grid-step overhead, and giving an even number
    (>= 2) of grid steps when the batch allows it so v7x's second TensorCore
    stays balanced under dimension_semantics=("parallel",)."""
    b128 = _cdiv(B, 128) * 128
    tb = max(128, min((batch_tile // 128) * 128, b128))
    nt = _cdiv(b128, tb)
    if nt == 1:
        if b128 >= 256:
            nt = 2
    elif nt % 2 == 1:
        nt += 1
    tb = max(128, _cdiv(_cdiv(b128, nt), 128) * 128)
    return tb


def net1_forward(Z, weights, biases, *, positive=False, sigmoid=False,
                 batch_tile=8192, compute_dtype=None):
    """Run the Net1 forward pass with a single Pallas kernel.

    Z:       (B, n_trees) float32
    weights: list of (in_dim, out_dim) float32 arrays (last is (width, 1))
    biases:  list of (1, out_dim) float32 arrays
    returns: (B, 1) float32
    """
    B, n_trees = Z.shape
    num_linear = len(weights)
    assert len(biases) == num_linear
    assert num_linear >= 2
    assert weights[-1].shape[1] == 1

    if compute_dtype is None:
        compute_dtype = _auto_compute_dtype()

    tb = _choose_batch_tile(B, batch_tile)
    num_tiles = _cdiv(B, tb)
    B_pad = num_tiles * tb
    if B_pad != B:
        # Padded rows flow through tanh/softplus/sigmoid harmlessly and are
        # sliced off at the end.
        Z = jnp.pad(Z, ((0, B_pad - B), (0, 0)))

    kernel = _make_mlp_kernel(num_linear, positive, sigmoid, compute_dtype)

    # Z tiled along batch; parameters are tiny and grid-invariant (constant
    # index_map -> fetched once, not per grid step).
    in_specs = [pl.BlockSpec((tb, n_trees), lambda i: (i, 0))]
    flat_params = []
    for l, (w, b) in enumerate(zip(weights, biases)):
        w = jnp.asarray(w, jnp.float32)
        b = jnp.asarray(b, jnp.float32)
        if l < num_linear - 1:
            w = w.T.astype(compute_dtype)        # (out, in), compute dtype
            b = b.reshape(-1, 1)                 # (out, 1), f32
        else:
            w = w.reshape(-1, 1)                 # (width, 1), f32
            b = b.reshape(1, 1)                  # (1, 1), f32
        in_specs.append(pl.BlockSpec(w.shape, lambda i: (0, 0)))
        in_specs.append(pl.BlockSpec(b.shape, lambda i: (0, 0)))
        flat_params.append(w)
        flat_params.append(b)

    # Lane-dense output: (1, B_pad) written in unmasked (1, tb) rows; the
    # wrapper reshapes back to (B, 1).
    out_specs = pl.BlockSpec((1, tb), lambda i: (0, i))

    # Rough in-kernel VMEM budget: the (tb, n_trees) Z block lane-pads to
    # (tb, 128) f32 and is double-buffered, the (1, tb) output block sublane-
    # pads to (8, tb) x2, plus a handful of (width, tb) live intermediates.
    max_width = max(int(w.shape[1]) for w in weights)
    vmem_budget = (2 * tb * 128 * 4          # Z blocks (lane-padded, x2)
                   + 2 * 8 * tb * 4          # output blocks (sublane-padded)
                   + 6 * tb * max(64, max_width) * 4   # live intermediates
                   + (4 << 20))              # headroom
    vmem_limit = int(min(56 << 20, max(32 << 20, vmem_budget)))

    flops = 2 * B_pad * sum(int(w.shape[0]) * int(w.shape[1]) for w in weights)
    transcendentals = B_pad * sum(int(w.shape[1]) for w in weights[:-1])
    if positive or sigmoid:
        transcendentals += B_pad
    bytes_accessed = (int(Z.size) * Z.dtype.itemsize
                      + sum(int(p.size) * p.dtype.itemsize for p in flat_params)
                      + B_pad * 4)

    # TODO(synk): with nn_width=32 the hidden-weight matmuls are only 32/256
    # MXU-tall; nn_width=128 would be the cleanest further win if the model
    # config allows it.
    out = pl.pallas_call(
        kernel,
        out_shape=jax.ShapeDtypeStruct((1, B_pad), jnp.float32),
        grid_spec=pltpu.PrefetchScalarGridSpec(
            num_scalar_prefetch=0,
            grid=(num_tiles,),
            in_specs=in_specs,
            out_specs=out_specs,
        ),
        compiler_params=pltpu.CompilerParams(
            dimension_semantics=("parallel",),
            vmem_limit_bytes=vmem_limit),
        cost_estimate=pl.CostEstimate(
            flops=flops,
            transcendentals=transcendentals,
            bytes_accessed=bytes_accessed),
    )(Z, *flat_params)

    return out.reshape(B_pad, 1)[:B]


def init_net1_params(key, n_trees, nn_width, nn_num_layers):
    """Deterministic init mirroring torch.nn.Linear default
    (U(-1/sqrt(fan_in), 1/sqrt(fan_in)))."""
    dims = [n_trees] + [nn_width] * nn_num_layers + [1]
    weights, biases = [], []
    for l in range(len(dims) - 1):
        fan_in, fan_out = dims[l], dims[l + 1]
        key, kw, kb = jax.random.split(key, 3)
        bound = 1.0 / jnp.sqrt(jnp.float32(fan_in))
        w = jax.random.uniform(kw, (fan_in, fan_out), jnp.float32, -bound, bound)
        b = jax.random.uniform(kb, (1, fan_out), jnp.float32, -bound, bound)
        weights.append(w)
        biases.append(b)
    return weights, biases


def net1_reference(Z, weights, biases, *, positive=False, sigmoid=False):
    """Pure-JAX reference for correctness checking."""
    h = Z
    for l, (w, b) in enumerate(zip(weights, biases)):
        h = h @ w + b
        if l < len(weights) - 1:
            h = jnp.tanh(h)
    if positive:
        h = jax.nn.softplus(h)
    elif sigmoid:
        h = jax.nn.sigmoid(h)
    return h


if __name__ == "__main__":
    # Small shapes consistent with the module: params['n_trees']=8,
    # nn_width=32, nn_num_layers=2.
    n_trees = 8
    nn_width = 32
    nn_num_layers = 2

    key = jax.random.PRNGKey(0)

    configs = [
        dict(batch=128, positive=False, sigmoid=False),  # base config, 1 tile
        dict(batch=200, positive=True, sigmoid=False),   # padding + softplus
        dict(batch=256, positive=False, sigmoid=True),   # 2 tiles + sigmoid
        dict(batch=640, positive=True, sigmoid=False),   # multi-tile + padding
    ]

    for cfg in configs:
        key, kz, kp = jax.random.split(key, 3)
        Z = jax.random.normal(kz, (cfg["batch"], n_trees), dtype=jnp.float32)
        weights, biases = init_net1_params(kp, n_trees, nn_width, nn_num_layers)

        ref = net1_reference(Z, weights, biases,
                             positive=cfg["positive"], sigmoid=cfg["sigmoid"])

        # 1) f32 compute path: bit-accurate-ish, tight tolerance.
        out_f32 = net1_forward(Z, weights, biases,
                               positive=cfg["positive"], sigmoid=cfg["sigmoid"],
                               compute_dtype=jnp.float32)
        out_f32 = jax.block_until_ready(out_f32)
        assert out_f32.shape == (cfg["batch"], 1)
        assert jnp.allclose(out_f32, ref, atol=1e-5, rtol=1e-5), (
            f"f32 mismatch vs reference: {cfg}, "
            f"max abs diff {float(jnp.max(jnp.abs(out_f32 - ref)))}")

        # 2) Auto compute dtype (bf16 on v6e/v7x, f32 on v5e): loose tolerance.
        out_auto = net1_forward(Z, weights, biases,
                                positive=cfg["positive"], sigmoid=cfg["sigmoid"])
        out_auto = jax.block_until_ready(out_auto)
        assert out_auto.shape == (cfg["batch"], 1)
        assert jnp.allclose(out_auto, ref, atol=5e-2, rtol=5e-2), (
            f"auto-dtype mismatch vs reference: {cfg}, "
            f"max abs diff {float(jnp.max(jnp.abs(out_auto - ref)))}")

    print("KERNEL_OK")
</pallas_src>

<mosaic_0001>
module attributes {stable_mosaic.version = 11 : i64} {
  func.func @kernel(%arg0: i32, %arg1: memref<128x8xf32, #tpu.memory_space<vmem>>, %arg2: memref<32x8xf32, #tpu.memory_space<vmem>>, %arg3: memref<32x1xf32, #tpu.memory_space<vmem>>, %arg4: memref<32x32xf32, #tpu.memory_space<vmem>>, %arg5: memref<32x1xf32, #tpu.memory_space<vmem>>, %arg6: memref<32x1xf32, #tpu.memory_space<vmem>>, %arg7: memref<1x1xf32, #tpu.memory_space<vmem>>, %arg8: memref<1x128xf32, #tpu.memory_space<vmem>>) attributes {dimension_semantics = [#tpu.dimension_semantics<parallel>], iteration_bounds = array<i64: 1>, scalar_prefetch = 0 : i64, scratch_operands = 0 : i64, tpu.core_type = #tpu.core_type<tc>, window_params = [{transform_indices = @transform_0, window_bounds = array<i64: 128, 8>}, {pipeline_mode = #tpu.pipeline_mode<synchronous>, transform_indices = @transform_1, window_bounds = array<i64: 32, 8>}, {pipeline_mode = #tpu.pipeline_mode<synchronous>, transform_indices = @transform_2, window_bounds = array<i64: 32, 1>}, {pipeline_mode = #tpu.pipeline_mode<synchronous>, transform_indices = @transform_3, window_bounds = array<i64: 32, 32>}, {pipeline_mode = #tpu.pipeline_mode<synchronous>, transform_indices = @transform_4, window_bounds = array<i64: 32, 1>}, {pipeline_mode = #tpu.pipeline_mode<synchronous>, transform_indices = @transform_5, window_bounds = array<i64: 32, 1>}, {pipeline_mode = #tpu.pipeline_mode<synchronous>, transform_indices = @transform_6, window_bounds = array<i64: 1, 1>}, {transform_indices = @transform_7, window_bounds = array<i64: 1, 128>}]} {
    %c0 = arith.constant 0 : index
    %c0_0 = arith.constant 0 : index
    %0 = vector.load %arg1[%c0, %c0_0] : memref<128x8xf32, #tpu.memory_space<vmem>>, vector<128x8xf32>
    %c0_1 = arith.constant 0 : index
    %c0_2 = arith.constant 0 : index
    %1 = vector.load %arg2[%c0_1, %c0_2] : memref<32x8xf32, #tpu.memory_space<vmem>>, vector<32x8xf32>
    %c0_3 = arith.constant 0 : index
    %c0_4 = arith.constant 0 : index
    %2 = vector.load %arg3[%c0_3, %c0_4] : memref<32x1xf32, #tpu.memory_space<vmem>>, vector<32x1xf32>
    %cst = arith.constant dense<0.000000e+00> : vector<32x128xf32>
    %3 = tpu.matmul %1, %0, %cst {dimension_numbers = #tpu.dot_dimension_numbers<[1], [1], [0], [0], [0, 0, 1, 0], [], []>} : vector<32x8xf32>, vector<128x8xf32>, vector<32x128xf32> -> vector<32x128xf32>
    %4 = vector.broadcast %2 : vector<32x1xf32> to vector<32x128xf32>
    %5 = arith.addf %3, %4 : vector<32x128xf32>
    %6 = math.tanh %5 : vector<32x128xf32>
    %c0_5 = arith.constant 0 : index
    %c0_6 = arith.constant 0 : index
    %7 = vector.load %arg4[%c0_5, %c0_6] : memref<32x32xf32, #tpu.memory_space<vmem>>, vector<32x32xf32>
    %c0_7 = arith.constant 0 : index
    %c0_8 = arith.constant 0 : index
    %8 = vector.load %arg5[%c0_7, %c0_8] : memref<32x1xf32, #tpu.memory_space<vmem>>, vector<32x1xf32>
    %cst_9 = arith.constant dense<0.000000e+00> : vector<32x128xf32>
    %9 = tpu.matmul %7, %6, %cst_9 {dimension_numbers = #tpu.dot_dimension_numbers<[1], [0], [0], [1], [0, 0, 1, 1], [], []>} : vector<32x32xf32>, vector<32x128xf32>, vector<32x128xf32> -> vector<32x128xf32>
    %10 = vector.broadcast %8 : vector<32x1xf32> to vector<32x128xf32>
    %11 = arith.addf %9, %10 : vector<32x128xf32>
    %12 = math.tanh %11 : vector<32x128xf32>
    %c0_10 = arith.constant 0 : index
    %c0_11 = arith.constant 0 : index
    %13 = vector.load %arg6[%c0_10, %c0_11] : memref<32x1xf32, #tpu.memory_space<vmem>>, vector<32x1xf32>
    %c0_12 = arith.constant 0 : index
    %c0_13 = arith.constant 0 : index
    %14 = vector.load %arg7[%c0_12, %c0_13] : memref<1x1xf32, #tpu.memory_space<vmem>>, vector<1x1xf32>
    %15 = vector.broadcast %13 : vector<32x1xf32> to vector<32x128xf32>
    %16 = arith.mulf %12, %15 : vector<32x128xf32>
    %cst_14 = arith.constant dense<0.000000e+00> : vector<128xf32>
    %17 = vector.multi_reduction <add>, %16, %cst_14 [0] : vector<32x128xf32> to vector<128xf32>
    %18 = vector.shape_cast %17 : vector<128xf32> to vector<1x128xf32>
    %19 = vector.broadcast %14 : vector<1x1xf32> to vector<1x128xf32>
    %20 = arith.addf %18, %19 : vector<1x128xf32>
    %c0_15 = arith.constant 0 : index
    %c0_16 = arith.constant 0 : index
    %21 = vector.load %arg8[%c0_15, %c0_16] : memref<1x128xf32, #tpu.memory_space<vmem>>, vector<1x128xf32>
    tpu.vector_store %arg8[%c0_15, %c0_16], %20 {strides = array<i32>} : memref<1x128xf32, #tpu.memory_space<vmem>>, vector<1x128xf32>,
    return
  }
  func.func @transform_0(%arg0: i32) -> (i32, i32) {
    %c0_i32 = arith.constant 0 : i32
    %c0_i32_0 = arith.constant 0 : i32
    return %arg0, %c0_i32 : i32, i32
  }
  func.func @transform_1(%arg0: i32) -> (i32, i32) {
    %c0_i32 = arith.constant 0 : i32
    %c0_i32_0 = arith.constant 0 : i32
    %c0_i32_1 = arith.constant 0 : i32
    return %c0_i32, %c0_i32_0 : i32, i32
  }
  func.func @transform_2(%arg0: i32) -> (i32, i32) {
    %c0_i32 = arith.constant 0 : i32
    %c0_i32_0 = arith.constant 0 : i32
    %c0_i32_1 = arith.constant 0 : i32
    return %c0_i32, %c0_i32_0 : i32, i32
  }
  func.func @transform_3(%arg0: i32) -> (i32, i32) {
    %c0_i32 = arith.constant 0 : i32
    %c0_i32_0 = arith.constant 0 : i32
    %c0_i32_1 = arith.constant 0 : i32
    return %c0_i32, %c0_i32_0 : i32, i32
  }
  func.func @transform_4(%arg0: i32) -> (i32, i32) {
    %c0_i32 = arith.constant 0 : i32
    %c0_i32_0 = arith.constant 0 : i32
    %c0_i32_1 = arith.constant 0 : i32
    return %c0_i32, %c0_i32_0 : i32, i32
  }
  func.func @transform_5(%arg0: i32) -> (i32, i32) {
    %c0_i32 = arith.constant 0 : i32
    %c0_i32_0 = arith.constant 0 : i32
    %c0_i32_1 = arith.constant 0 : i32
    return %c0_i32, %c0_i32_0 : i32, i32
  }
  func.func @transform_6(%arg0: i32) -> (i32, i32) {
    %c0_i32 = arith.constant 0 : i32
    %c0_i32_0 = arith.constant 0 : i32
    %c0_i32_1 = arith.constant 0 : i32
    return %c0_i32, %c0_i32_0 : i32, i32
  }
  func.func @transform_7(%arg0: i32) -> (i32, i32) {
    %c0_i32 = arith.constant 0 : i32
    %c0_i32_0 = arith.constant 0 : i32
    return %c0_i32, %arg0 : i32, i32
  }
}

</mosaic_0001>

<bundles_post_ra>
// kernel: tpu_custom_call.1
= control target key start
LH: loop header
LB: loop body
LE: loop exit
PB: predicated region body
PF: predicated region fallthrough
CT: control target
= control target key end

     0   :  { %s831_s0 = inlined_call_operand.vmem [shape: f32[128,8], index: 0, kind: input, shape index: {}]   ;;  %s832_s1 = inlined_call_operand.vmem [shape: f32[32,8], index: 1, kind: input, shape index: {}]   ;;  %s833_s2 = inlined_call_operand.vmem [shape: f32[32,1], index: 2, kind: input, shape index: {}]   ;;  %s834_s3 = inlined_call_operand.vmem [shape: f32[32,32], index: 3, kind: input, shape index: {}]   ;;  %s835_s4 = inlined_call_operand.vmem [shape: f32[32,1], index: 4, kind: input, shape index: {}]   ;;  %s836_s5 = inlined_call_operand.vmem [shape: f32[32,1], index: 5, kind: input, shape index: {}]   ;;  %s837_s6 = inlined_call_operand.<no memory space> [shape: f32[1,1], index: 6, kind: input, shape index: {}]   ;;  %s838_s7 = inlined_call_operand.hbm [shape: f32[1,128], index: 7, kind: output, shape index: {}]  }
   0x1   :  { %v12_v0 = vstv %s837_s6 }
   0x2   :  { %13 = vst [vmem:[#allocation2] sm:$0x1] %v12_v0 }
   0x3   :  { %v29_v1 = vld [vmem:[%s831_s0] sm:$0xff]  ;;  %v30_v2 = vld [vmem:[%s831_s0 + $0x8] sm:$0xff]  ;;  %vm73_vm0 = vcmask 64512   ;;  %v31_v3 = vld [vmem:[%s831_s0 + $0x10] sm:$0xff]  ;;  %v620_v7 = vmov 0  }
   0x4   :  { %v520_v4 = vpack.c.bf16 %v30_v2, %v29_v1  ;;  %vm676_vm1 = vmpackc.low %vm73_vm0, %vm73_vm0  ;;  %v32_v6 = vld [vmem:[%s831_s0 + $0x18] sm:$0xff]  ;;  %578 = vset.pattern.permute.xlu0 %v620_v7  ;;  %579 = vset.pattern.permute.xlu1 %v620_v7  ;;  %v45_v9 = vld [vmem:[%s832_s1] sm:$0xff] }
   0x5   :  { %v526_v8 = vpack.c.bf16 %v32_v6, %v31_v3  ;;  %v33_v10 = vld [vmem:[%s831_s0 + $0x20] sm:$0xff]  ;;  %v34_v11 = vld [vmem:[%s831_s0 + $0x28] sm:$0xff]  ;;  %500 = vmatprep.mubr.msk.f32.mxu0 %vm73_vm0, %v45_v9  ;;  %v51_v13 = vld [vmem:[%s833_s2 + $0x10] sm:$0xff] }
   0x6   :  { %522 = vmatprep.subr.msk.bf16.mxu0 %vm676_vm1, %v520_v4  ;;  %v49_v12 = vld [vmem:[%s833_s2] sm:$0xff]  ;;  %65 = vperm.xlu1 %579, %v51_v13   ;;  %v532_v14 = vpack.c.bf16 %v34_v11, %v33_v10  ;;  %v50_v15 = vld [vmem:[%s833_s2 + $0x8] sm:$0xff]  ;;  %v52_v16 = vld [vmem:[%s833_s2 + $0x18] sm:$0xff] }
   0x7   :  { %525 = vmatpush3.bf16.xpose.msk.msra.mxu0 %vm676_vm1, %v520_v4  ;;  %55 = vperm.xlu0 %578, %v49_v12  }
   0x8   :  { %528 = vmatprep.subr.msk.bf16.mxu0 %vm676_vm1, %v526_v8 }
   0x9   :  { %14 = vsyncpa [#allocation4], 0  ;;  %v227_v17 = vld [vmem:[%s835_s4] sm:$0xff]  ;;  %v35_v18 = vld [vmem:[%s831_s0 + $0x30] sm:$0xff]  ;;  %vm251_vm2 = vcmask 261120  }
   0xa   :  { %70 = vperm.xlu1 %579, %v52_v16   ;;  %v36_v19 = vld [vmem:[%s831_s0 + $0x38] sm:$0xff]  ;;  %v228_v20 = vld [vmem:[%s835_s4 + $0x8] sm:$0xff]  ;;  %v229_v22 = vld [vmem:[%s835_s4 + $0x10] sm:$0xff] }
   0xb   :  { %60 = vperm.xlu0 %578, %v50_v15   ;;  %v538_v21 = vpack.c.bf16 %v36_v19, %v35_v18  ;;  %v230_v23 = vld [vmem:[%s835_s4 + $0x18] sm:$0xff]  ;;  %v353_v24 = vld [vmem:[%s836_s5] sm:$0xff]  ;;  %v38_v26 = vld [vmem:[%s831_s0 + $0x48] sm:$0xff] }
   0xc   :  { %v37_v25 = vld [vmem:[%s831_s0 + $0x40] sm:$0xff]  ;;  %v354_v27 = vld [vmem:[%s836_s5 + $0x8] sm:$0xff]  ;;  %v355_v29 = vld [vmem:[%s836_s5 + $0x10] sm:$0xff] }
   0xd   :  { %v544_v28 = vpack.c.bf16 %v38_v26, %v37_v25  ;;  %v356_v30 = vld [vmem:[%s836_s5 + $0x18] sm:$0xff]  ;;  %v357_v31 = vld [vmem:[#allocation2] sm:$0x1]  ;;  %v39_v32 = vld [vmem:[%s831_s0 + $0x50] sm:$0xff] }
   0xe   :  { %238 = vperm.xlu1 %579, %v228_v20   ;;  %v40_v33 = vld [vmem:[%s831_s0 + $0x58] sm:$0xff]  ;;  %v41_v35 = vld [vmem:[%s831_s0 + $0x60] sm:$0xff]  ;;  %v42_v36 = vld [vmem:[%s831_s0 + $0x68] sm:$0xff] }
   0xf   :  { %531 = vmatpush3.bf16.xpose.msk.msra.mxu0 %vm676_vm1, %v526_v8  ;;  %233 = vperm.xlu0 %578, %v227_v17   ;;  %v550_v34 = vpack.c.bf16 %v40_v33, %v39_v32  ;;  %v556_v37 = vpack.c.bf16 %v42_v36, %v41_v35  ;;  %v43_v38 = vld [vmem:[%s831_s0 + $0x70] sm:$0xff]  ;;  %v44_v39 = vld [vmem:[%s831_s0 + $0x78] sm:$0xff]  ;;  %v46_v41 = vld [vmem:[%s832_s1 + $0x8] sm:$0xff] }
  0x10   :  { %534 = vmatprep.subr.msk.bf16.mxu0 %vm676_vm1, %v532_v14  ;;  %v562_v40 = vpack.c.bf16 %v44_v39, %v43_v38  ;;  %v47_v42 = vld [vmem:[%s832_s1 + $0x10] sm:$0xff]  ;;  %v48_v43 = vld [vmem:[%s832_s1 + $0x18] sm:$0xff]  ;;  %v223_v44 = vld [vmem:[%s834_s3] sm:$0xff] }
  0x11   :  { %514 = vmatprep.mubr.msk.f32.mxu1 %vm251_vm2, %v223_v44  ;;  %v224_v63 = vld [vmem:[%s834_s3 + $0x8] sm:$0xff]  ;;  %v225_v0 = vld [vmem:[%s834_s3 + $0x10] sm:$0xff]  ;;  %v226_v1 = vld [vmem:[%s834_s3 + $0x18] sm:$0xff]  ;;  %s621_s3 = smov [#allocation3]  }
  0x12   :  { %248 = vperm.xlu1 %579, %v230_v23   ;;  %s408_s19 = sshll.u32 %s621_s3, 4  ;;  %s409_s19 = int_to_ptr.vmem [resolvable:$true] %s408_s19 }
  0x13   :  { %243 = vperm.xlu0 %578, %v229_v22   ;;  %s596_s20 = scalar_lea.vmem %s409_s19, 16  ;;  %s600_s21 = scalar_lea.vmem %s409_s19, 32 }
  0x14   :  { %p597_p0 = scmp.ne.s32.totalorder %s409_s19, %s596_s20  ;;  %p601_p1 = scmp.lt.s32.totalorder %s409_s19, %s409_s19 }
  0x15   :  { %p602_p2 = scmp.lt.s32.totalorder %s600_s21, %s596_s20 }
  0x16   :  { %365 = vperm.xlu1 %579, %v354_v27  }
  0x17   :  { %537 = vmatpush3.bf16.xpose.msk.msra.mxu0 %vm676_vm1, %v532_v14  ;;  %360 = vperm.xlu0 %578, %v353_v24   ;;  %p603_p3 = por %p602_p2, %p601_p1 }
  0x18   :  { %540 = vmatprep.subr.msk.bf16.mxu0 %vm676_vm1, %v538_v21 }
  0x19   :  { %p604_p4 = pnand %p603_p3, %p597_p0 }
  0x1a   :  { %375 = vperm.xlu1 %579, %v356_v30  }
  0x1b   :  { %370 = vperm.xlu0 %578, %v355_v29  }
  0x1f   :  { %543 = vmatpush3.bf16.xpose.msk.msra.mxu0 %vm676_vm1, %v538_v21  ;;  %393 = vperm.xlu0 %578, %v357_v31  }
  0x20   :  { %546 = vmatprep.subr.msk.bf16.mxu0 %vm676_vm1, %v544_v28 }
  0x27   :  { %549 = vmatpush3.bf16.xpose.msk.msra.mxu0 %vm676_vm1, %v544_v28  ;;  %v396_v28 = vlaneseq }
  0x28   :  { %552 = vmatprep.subr.msk.bf16.mxu0 %vm676_vm1, %v550_v34 }
  0x29   :  { %v397_v31 = vshrl.u32 %v396_v28, 7 }
  0x2f   :  { %555 = vmatpush3.bf16.xpose.msk.msra.mxu0 %vm676_vm1, %v550_v34  ;;  %v398_v34 = vsub.s32 0, %v397_v31 }
  0x30   :  { %558 = vmatprep.subr.msk.bf16.mxu0 %vm676_vm1, %v556_v37 }
  0x37   :  { %561 = vmatpush3.bf16.xpose.msk.msra.mxu0 %vm676_vm1, %v556_v37 }
  0x38   :  { %564 = vmatprep.subr.msk.bf16.mxu0 %vm676_vm1, %v562_v40 }
  0x3f   :  { %567 = vmatpush3.bf16.xpose.msk.msra.mxu0 %vm676_vm1, %v562_v40 }
  0x46   :  { %501 = vmatmul.mubr.msk.f32.vlgmr.msra.gmra.mrb[0].mxu0 %vm73_vm0, %v46_v41 }
  0x47   :  { %503 = vmatprep.mubr.msk.f32.mxu0 %vm73_vm0, %v47_v42 }
  0x4a   :  { %504 = vmatmul.mubr.msk.f32.gmra.mrb[2].mxu0 %vm73_vm0, %v48_v43 }
  0x85   :  { %v66_v46 = vpop.permute.xlu1 %65 }
  0x86   :  { %v56_v45 = vpop.permute.xlu0 %55 }
  0x89   :  { %v71_v52 = vpop.permute.xlu1 %70 }
  0x8a   :  { %v61_v47 = vpop.permute.xlu0 %60 }
  0x8d   :  { %v239_v2 = vpop.permute.xlu1 %238 }
  0x8e   :  { %v234_v3 = vpop.permute.xlu0 %233 }
  0x91   :  { %v249_v8 = vpop.permute.xlu1 %248 }
  0x92   :  { %v244_v10 = vpop.permute.xlu0 %243 }
  0x95   :  { %v366_v16 = vpop.permute.xlu1 %365 }
  0x96   :  { %v361_v14 = vpop.permute.xlu0 %360 }
  0x99   :  { %v376_v25 = vpop.permute.xlu1 %375 }
  0x9a   :  { %v371_v23 = vpop.permute.xlu0 %370 }
  0x9e   :  { %v394_v36 = vpop.permute.xlu0 %393 }
  0x9f   :  { %v399_v38 = vrot.slane %v394_v36, %v398_v34 }
 0x119   :  { %v502_v48 = vpop.f32.mrb[0].mxu0 }
 0x11a   :  { %v206_v49 = vadd.f32 %v502_v48, %v61_v47  ;;  %v200_v50 = vpop.f32.mrb[1].mxu0 }
 0x11b   :  { %v201_v51 = vadd.f32 %v200_v50, %v56_v45 }
 0x11c   :  { %580 = vtanh.f32 %v206_v49 }
 0x11d   :  { %582 = vtanh.f32 %v201_v51  ;;  %v505_v53 = vpop.f32.mrb[2].mxu0 }
 0x11e   :  { %v216_v54 = vadd.f32 %v505_v53, %v71_v52  ;;  %v210_v55 = vpop.f32.mrb[3].mxu0 }
 0x11f   :  { %v211_v56 = vadd.f32 %v210_v55, %v66_v46 }
 0x120   :  { %584 = vtanh.f32 %v216_v54 }
 0x121   :  { %586 = vtanh.f32 %v211_v56 }
 0x126   :  { %v581_v57 = vpop.eup %580 }
 0x127   :  { %v583_v58 = vpop.eup %582 }
 0x128   :  { %v568_v59 = vpack.c.bf16 %v581_v57, %v583_v58 }
 0x12a   :  { %v585_v60 = vpop.eup %584  ;;  %569 = vmatprep.subr.bf16.mxu1 %v568_v59 }
 0x12b   :  { %v587_v61 = vpop.eup %586  ;;  %571 = vmatpush3.bf16.msra.mxu1 %v568_v59 }
 0x12c   :  { %v572_v62 = vpack.c.bf16 %v585_v60, %v587_v61 }
 0x12e   :  { %573 = vmatprep.subr.bf16.mxu1 %v572_v62 }
 0x12f   :  { %575 = vmatpush3.bf16.msra.mxu1 %v572_v62 }
 0x132   :  { %515 = vmatmul.mubr.msk.f32.vlgmr.msra.gmra.mrb[0].mxu1 %vm251_vm2, %v224_v63 }
 0x133   :  { %517 = vmatprep.mubr.msk.f32.mxu1 %vm251_vm2, %v225_v0 }
 0x136   :  { %518 = vmatmul.mubr.msk.f32.gmra.mrb[2].mxu1 %vm251_vm2, %v226_v1 }
 0x205   :  { %v516_v4 = vpop.f32.mrb[0].mxu1 }
 0x206   :  { %v336_v5 = vadd.f32 %v516_v4, %v239_v2  ;;  %v330_v6 = vpop.f32.mrb[1].mxu1 }
 0x207   :  { %v331_v7 = vadd.f32 %v330_v6, %v234_v3 }
 0x208   :  { %588 = vtanh.f32 %v336_v5 }
 0x209   :  { %590 = vtanh.f32 %v331_v7  ;;  %v519_v9 = vpop.f32.mrb[2].mxu1 }
 0x20a   :  { %v346_v11 = vadd.f32 %v519_v9, %v249_v8  ;;  %v340_v12 = vpop.f32.mrb[3].mxu1 }
 0x20b   :  { %v341_v13 = vadd.f32 %v340_v12, %v244_v10 }
 0x20c   :  { %592 = vtanh.f32 %v346_v11 }
 0x20d   :  { %594 = vtanh.f32 %v341_v13 }
 0x212   :  { %v589_v15 = vpop.eup %588 }
 0x213   :  { %v591_v17 = vpop.eup %590  ;;  %v379_v18 = vmul.f32 %v589_v15, %v366_v16 }
 0x214   :  { %v378_v19 = vmul.f32 %v591_v17, %v361_v14 }
 0x216   :  { %v593_v20 = vpop.eup %592  ;;  %v382_v21 = vadd.f32 %v379_v18, %v378_v19 }
 0x217   :  { %v595_v22 = vpop.eup %594  ;;  %v381_v26 = vmul.f32 %v593_v20, %v376_v25 }
 0x218   :  { %v380_v24 = vmul.f32 %v595_v22, %v371_v23 }
 0x21a   :  { %v383_v27 = vadd.f32 %v382_v21, %v380_v24 }
 0x21c   :  { %v384_v29 = vadd.f32 %v383_v27, %v381_v26 }
 0x21e   :  { %v385_v30 = vrot.slane %v384_v29, 4 }
 0x220   :  { %v386_v32 = vadd.f32 %v385_v30, %v384_v29 }
 0x222   :  { %v387_v33 = vrot.slane %v386_v32, 2 }
 0x224   :  { %v388_v35 = vadd.f32 %v387_v33, %v386_v32 }
 0x226   :  { %v389_v37 = vrot.slane %v388_v35, 1 }
 0x228   :  { %v390_v39 = vadd.f32 %v389_v37, %v388_v35 }
 0x22a   :  { %v400_v40 = vadd.f32 %v399_v38, %v390_v39 }
 0x22c   :  { %401 = vst [vmem:[#allocation3] sm:$0x1] %v400_v40 }
 0x22d   :  { %607 = shalt.err (!%p604_p4)
}
 0x22e   :  { %s608_s24 = scalar_lea.hbm %s838_s7, 16 }
 0x22f   :  { %p609_p5 = scmp.ne.s32.totalorder %s838_s7, %s608_s24  ;;  %p612_p6 = scmp.lt.u32.totalorder %s608_s24, %s838_s7 }
 0x231   :  { %p614_p7 = pnand %p612_p6, %p609_p5 }
 0x233   :  { %617 = shalt.err (!%p614_p7)
}
 0x234   :  { %411 = dma.vmem_to_hbm [thread:$0]  %s409_s19, 16, %s838_s7, [#allocation4]  }
 0x235   :  { %618 = dma.done.wait [#allocation4], 16  }
 0x236   :  { %619 = vsyncadd [#allocation4], 4294967280 }
 0x237   :  { %415 = vsyncpa [#allocation4], 1 }

</bundles_post_ra>
